<compile_context>
chip_gen: v5e
topology: v5e:2x2
jax: 0.10.0
libtpu: 0.0.40
codegen_flags: <defaults>
</compile_context>

<pallas_src>
import functools

import jax
import jax.numpy as jnp
from jax.experimental import pallas as pl
from jax.experimental.pallas import tpu as pltpu


def _l2norm_kernel(x_ref, o_ref, *, eps):
    x = x_ref[...].astype(jnp.float32)                  # [TB, D]
    sq = jnp.sum(x * x, axis=-1, keepdims=True)         # [TB, 1] cross-lane reduce (XLU)
    denom = jnp.maximum(jnp.sqrt(sq), eps)              # clamp_min(eps), as in F.normalize
    scale = 1.0 / denom                                 # reciprocal on the narrow column only
    o_ref[...] = (x * scale).astype(o_ref.dtype)


def l2_normalize(x, eps=1e-12, block_rows=1024, vmem_block_bytes=4 << 20):
    """L2-normalize along the last dim. Accepts any leading shape."""
    orig_shape = x.shape
    D = orig_shape[-1]
    R = 1
    for s in orig_shape[:-1]:
        R *= s
    x2 = x.reshape(R, D)

    # Row tile: as large as possible within a VMEM budget (f32 working copy),
    # rounded down to a multiple of 8 sublanes.
    tb = (vmem_block_bytes // (D * 4)) // 8 * 8
    tb = max(8, min(block_rows, tb))
    if R <= tb:
        # Single block spanning all rows — always a legal block shape.
        tb = R
    grid = (pl.cdiv(R, tb),)

    out = pl.pallas_call(
        functools.partial(_l2norm_kernel, eps=eps),
        out_shape=jax.ShapeDtypeStruct((R, D), x.dtype),
        grid=grid,
        in_specs=[pl.BlockSpec((tb, D), lambda i: (i, 0))],
        out_specs=pl.BlockSpec((tb, D), lambda i: (i, 0)),
        compiler_params=pltpu.CompilerParams(
            dimension_semantics=("parallel",)),
    )(x2)

    return out.reshape(orig_shape)


def _l2_normalize_ref(x, eps=1e-12):
    xf = x.astype(jnp.float32)
    norm = jnp.sqrt(jnp.sum(xf * xf, axis=-1, keepdims=True))
    return (xf / jnp.maximum(norm, eps)).astype(x.dtype)


if __name__ == "__main__":
    key = jax.random.PRNGKey(0)
    k1, k2, k3 = jax.random.split(key, 3)

    # Small shape consistent with the module: batch=2, seq=8, hidden=32.
    x = jax.random.normal(k1, (2, 8, 32), dtype=jnp.float32)
    y = l2_normalize(x)
    jax.block_until_ready(y)
    assert y.shape == x.shape
    assert jnp.allclose(y, _l2_normalize_ref(x), atol=1e-6, rtol=1e-6)

    # Exercises the ragged row grid (R=120, TB=64 -> grid of 2, last block 56 rows).
    x2 = jax.random.normal(k2, (3, 40, 128), dtype=jnp.float32)
    y2 = l2_normalize(x2, block_rows=64)
    jax.block_until_ready(y2)
    assert y2.shape == x2.shape
    assert jnp.allclose(y2, _l2_normalize_ref(x2), atol=1e-6, rtol=1e-6)

    # bf16 input: f32 accumulation in-kernel, cast back on store.
    x3 = jax.random.normal(k3, (2, 8, 32), dtype=jnp.bfloat16)
    y3 = l2_normalize(x3)
    jax.block_until_ready(y3)
    assert y3.shape == x3.shape
    assert jnp.allclose(y3.astype(jnp.float32),
                        _l2_normalize_ref(x3).astype(jnp.float32),
                        atol=2e-2, rtol=2e-2)

    print("KERNEL_OK")
</pallas_src>

<mosaic_0001>
module attributes {stable_mosaic.version = 11 : i64} {
  func.func @_l2norm_kernel(%arg0: i32, %arg1: memref<16x32xf32, #tpu.memory_space<vmem>>, %arg2: memref<16x32xf32, #tpu.memory_space<vmem>>) attributes {dimension_semantics = [#tpu.dimension_semantics<parallel>], iteration_bounds = array<i64: 1>, scalar_prefetch = 0 : i64, scratch_operands = 0 : i64, tpu.core_type = #tpu.core_type<tc>, window_params = [{transform_indices = @transform_0, window_bounds = array<i64: 16, 32>}, {transform_indices = @transform_1, window_bounds = array<i64: 16, 32>}]} {
    %c0 = arith.constant 0 : index
    %c0_0 = arith.constant 0 : index
    %0 = vector.load %arg1[%c0, %c0_0] : memref<16x32xf32, #tpu.memory_space<vmem>>, vector<16x32xf32>
    %1 = arith.mulf %0, %0 : vector<16x32xf32>
    %cst = arith.constant dense<0.000000e+00> : vector<16xf32>
    %2 = vector.multi_reduction <add>, %1, %cst [1] : vector<16x32xf32> to vector<16xf32>
    %3 = vector.shape_cast %2 : vector<16xf32> to vector<16x1xf32>
    %4 = math.sqrt %3 : vector<16x1xf32>
    %cst_1 = arith.constant 9.99999996E-13 : f32
    %5 = vector.broadcast %cst_1 : f32 to vector<16x1xf32>
    %6 = arith.maximumf %4, %5 : vector<16x1xf32>
    %cst_2 = arith.constant 1.000000e+00 : f32
    %7 = vector.broadcast %cst_2 : f32 to vector<16x1xf32>
    %8 = arith.divf %7, %6 : vector<16x1xf32>
    %9 = vector.broadcast %8 : vector<16x1xf32> to vector<16x32xf32>
    %10 = arith.mulf %0, %9 : vector<16x32xf32>
    %c0_3 = arith.constant 0 : index
    %c0_4 = arith.constant 0 : index
    %11 = vector.load %arg2[%c0_3, %c0_4] : memref<16x32xf32, #tpu.memory_space<vmem>>, vector<16x32xf32>
    tpu.vector_store %arg2[%c0_3, %c0_4], %10 {strides = array<i32>} : memref<16x32xf32, #tpu.memory_space<vmem>>, vector<16x32xf32>,
    return
  }
  func.func @transform_0(%arg0: i32) -> (i32, i32) {
    %c0_i32 = arith.constant 0 : i32
    %c0_i32_0 = arith.constant 0 : i32
    return %arg0, %c0_i32 : i32, i32
  }
  func.func @transform_1(%arg0: i32) -> (i32, i32) {
    %c0_i32 = arith.constant 0 : i32
    %c0_i32_0 = arith.constant 0 : i32
    return %arg0, %c0_i32 : i32, i32
  }
}

</mosaic_0001>

<bundles_post_ra>
// kernel: tpu_custom_call.1
= control target key start
LH: loop header
LB: loop body
LE: loop exit
PB: predicated region body
PF: predicated region fallthrough
CT: control target
= control target key end

     0   :  { %6 = vsyncpa [#allocation3], 0  ;;  %s214_s0 = inlined_call_operand.hbm [shape: f32[16,32], index: 0, kind: input, shape index: {}]   ;;  %s215_s1 = inlined_call_operand.hbm [shape: f32[16,32], index: 1, kind: output, shape index: {}]  }
   0x1   :  { %7 = vsyncpa [#allocation4], 0  ;;  %s12_s8 = sshll.u32 %s214_s0, 4  ;;  %s179_s9 = smov [#allocation2]   ;;  %s13_s8 = int_to_ptr.hbm [resolvable:$true] %s12_s8 }
   0x2   :  { %s14_s10 = sshll.u32 %s179_s9, 4  ;;  %s180_s11 = smov 128   ;;  %s15_s10 = int_to_ptr.vmem [resolvable:$true] %s14_s10 }
   0x3   :  { %s181_s12 = smov 8  }
   0x4   :  { %20 = dma.hbm_to_vmem [thread:$0]  %s13_s8, 256, %s15_s10, [#allocation3], %s180_s11, %s180_s11, %s181_s12  }
   0x5   :  { %175 = dma.done.wait [#allocation3], 256  }
   0x6   :  { %176 = vsyncadd [#allocation3], 4294967040  ;;  %v25_v0 = vld [vmem:[#allocation2] sm:$0xff]  ;;  %vm29_vm0 = vcmask 261120   ;;  %v199_v2 = vld [vmem:[#allocation2 + $0x8] sm:$0xff]  ;;  %s182_s0 = smov [#allocation5]  }
   0x7   :  { %v27_v1 = vmul.f32 %v25_v0, %v25_v0  ;;  %v28_v4 = vmul.f32 %v199_v2, %v199_v2  ;;  %s100_s13 = sshll.u32 %s182_s0, 4  ;;  %s102_s16 = sshll.u32 %s215_s1, 4  ;;  %s101_s13 = int_to_ptr.vmem [resolvable:$true] %s100_s13  ;;  %s103_s16 = int_to_ptr.hbm [resolvable:$true] %s102_s16 }
   0x9   :  { %v30_v3 = vsel %vm29_vm0, %v27_v1, 0.0  ;;  %v33_v5 = vsel %vm29_vm0, %v28_v4, 0.0 }
   0xa   :  { %31 = vadd.xlane.f32.xlu0 %v30_v3 }
  0x12   :  { %34 = vadd.xlane.f32.xlu0 %v33_v5 }
  0x7d   :  { %v32_v6 = vpop.xlane.xlu0 %31 }
  0x7e   :  { %119 = vrsqrt.f32 %v32_v6  ;;  %vm43_vm1 = vcmp.eq.f32.partialorder %v32_v6, inf  ;;  %v46_v18 = vand.u32 2147483648, %v32_v6  ;;  %vm45_vm2 = vcmp.eq.f32.partialorder %v32_v6, 0.0 }
  0x84   :  { %v120_v7 = vpop.eup %119 }
  0x85   :  { %v37_v8 = vmul.f32 %v120_v7, %v32_v6  ;;  %v35_v9 = vpop.xlane.xlu0 %34 }
  0x86   :  { %121 = vrsqrt.f32 %v35_v9  ;;  %vm55_vm3 = vcmp.eq.f32.partialorder %v35_v9, inf  ;;  %v58_v26 = vand.u32 2147483648, %v35_v9  ;;  %vm57_vm4 = vcmp.eq.f32.partialorder %v35_v9, 0.0 }
  0x87   :  { %v38_v10 = vmul.f32 %v120_v7, %v37_v8 }
  0x89   :  { %v39_v11 = vmul.f32 0.5, %v38_v10 }
  0x8b   :  { %v40_v12 = vsub.f32 1.5, %v39_v11 }
  0x8c   :  { %v122_v13 = vpop.eup %121 }
  0x8d   :  { %v41_v14 = vmul.f32 %v120_v7, %v40_v12  ;;  %v49_v15 = vmul.f32 %v122_v13, %v35_v9 }
  0x8f   :  { %v42_v16 = vmul.f32 %v41_v14, %v32_v6  ;;  %v50_v17 = vmul.f32 %v122_v13, %v49_v15 }
  0x91   :  { %v44_v19 = vsel %vm43_vm1, %v32_v6, %v42_v16  ;;  %v51_v20 = vmul.f32 0.5, %v50_v17 }
  0x92   :  { %v47_v21 = vsel %vm45_vm2, %v46_v18, %v44_v19 }
  0x93   :  { %v60_v22 = vmax.f32 %v47_v21, 1e-12  ;;  %v52_v23 = vsub.f32 1.5, %v51_v20 }
  0x95   :  { %123 = vrcp.f32 %v60_v22  ;;  %v53_v24 = vmul.f32 %v122_v13, %v52_v23  ;;  %v73_v33 = vand.u32 2147483648, %v60_v22  ;;  %v71_v35 = vand.u32 2147483647, %v60_v22 }
  0x96   :  { %vm67_vm6 = vweird.f32 %v60_v22 }
  0x97   :  { %v54_v25 = vmul.f32 %v53_v24, %v35_v9  ;;  %v74_v38 = vor.u32 1.1754944e-38, %v73_v33  ;;  %vm72_vm8 = vcmp.eq.f32.partialorder %v71_v35, 8.507059e+37 }
  0x99   :  { %v56_v27 = vsel %vm55_vm3, %v35_v9, %v54_v25 }
  0x9a   :  { %v59_v28 = vsel %vm57_vm4, %v58_v26, %v56_v27 }
  0x9b   :  { %v124_v29 = vpop.eup %123  ;;  %v61_v30 = vmax.f32 %v59_v28, 1e-12 }
  0x9c   :  { %v63_v31 = vmul.f32 %v124_v29, %v60_v22  ;;  %vm68_vm5 = vweird.f32 %v124_v29 }
  0x9d   :  { %125 = vrcp.f32 %v61_v30  ;;  %vm69_vm7 = vmor %vm67_vm6, %vm68_vm5  ;;  %v88_v44 = vand.u32 2147483648, %v61_v30  ;;  %v86_v46 = vand.u32 2147483647, %v61_v30  ;;  %vm82_vm10 = vweird.f32 %v61_v30 }
  0x9e   :  { %v64_v32 = vsub.f32 1.0, %v63_v31 }
  0x9f   :  { %v89_v48 = vor.u32 1.1754944e-38, %v88_v44  ;;  %vm87_vm12 = vcmp.eq.f32.partialorder %v86_v46, 8.507059e+37 }
  0xa0   :  { %v65_v34 = vmul.f32 %v124_v29, %v64_v32 }
  0xa2   :  { %v66_v36 = vadd.f32 %v124_v29, %v65_v34 }
  0xa3   :  { %v126_v37 = vpop.eup %125 }
  0xa4   :  { %v70_v39 = vsel %vm69_vm7, %v124_v29, %v66_v36  ;;  %v78_v40 = vmul.f32 %v126_v37, %v61_v30  ;;  %vm83_vm9 = vweird.f32 %v126_v37 }
  0xa5   :  { %v75_v41 = vsel %vm72_vm8, %v74_v38, %v70_v39  ;;  %vm84_vm11 = vmor %vm82_vm10, %vm83_vm9 }
  0xa6   :  { %v79_v42 = vsub.f32 1.0, %v78_v40  ;;  %v92_v43 = vmul.f32 %v75_v41, %v25_v0 }
  0xa8   :  { %v80_v45 = vmul.f32 %v126_v37, %v79_v42  ;;  %94 = vst.msk [vmem:[#allocation5] sm:$0xff] %vm29_vm0, %v92_v43 }
  0xaa   :  { %v81_v47 = vadd.f32 %v126_v37, %v80_v45 }
  0xac   :  { %v85_v49 = vsel %vm84_vm11, %v126_v37, %v81_v47 }
  0xad   :  { %v90_v50 = vsel %vm87_vm12, %v89_v48, %v85_v49 }
  0xae   :  { %v93_v51 = vmul.f32 %v90_v50, %v199_v2 }
  0xb0   :  { %95 = vst.msk [vmem:[#allocation5 + $0x8] sm:$0xff] %vm29_vm0, %v93_v51 }
  0xb1   :  { %108 = dma.vmem_to_hbm [thread:$0]  %s101_s13, 256, %s103_s16, [#allocation4], %s180_s11, %s180_s11, %s181_s12  }
  0xb2   :  { %177 = dma.done.wait [#allocation4], 256  }
  0xb3   :  { %178 = vsyncadd [#allocation4], 4294967040 }
  0xb4   :  { %113 = vsyncpa [#allocation3], 1 }
  0xb5   :  { %114 = vsyncpa [#allocation4], 1 }

</bundles_post_ra>
